<compile_context>
chip_gen: v6e
topology: v6e:2x2x1
jax: 0.10.0
libtpu: 0.0.40
codegen_flags: <defaults>
</compile_context>

<pallas_src>
import jax
import jax.numpy as jnp
from jax.experimental import pallas as pl
from jax.experimental.pallas import tpu as pltpu

NEG_SLOPE = 0.01          # nn.LeakyReLU default
TILE_B_MAX = 1024         # f32 x tile: 1024*1024*4B = 4 MiB, x2 buffers = 8 MiB
MIN_SUBLANE = 8           # f32 sublane packing
VMEM_LIMIT = 48 << 20     # fits every generation's physical VMEM


def _cdiv(a, b):
    return -(-a // b)


def _round_up(n, m):
    return ((n + m - 1) // m) * m


def mlp_kernel(x_ref, w1_ref, b1_ref, w2_ref, b2_ref, o_ref):
    # x tile arrives in f32 straight from HBM (no wrapper cast / extra copy).
    x = x_ref[...]                                          # [TB, F] f32
    h = jnp.where(x > 0, x, NEG_SLOPE * x)                  # LeakyReLU (f32: v5e-safe)
    # Linear(F -> 32): bf16 MXU issue, f32 accumulation.
    h1 = jnp.dot(h.astype(jnp.bfloat16), w1_ref[...],
                 preferred_element_type=jnp.float32) + b1_ref[...]
    # Dropout(0.5): identity in inference mode.
    # TODO(synk): training-mode dropout would need pltpu.prng_seed/prng_random_bits.
    h1 = jnp.where(h1 > 0, h1, NEG_SLOPE * h1)              # LeakyReLU
    # Linear(32 -> 10): bf16 issue as well (native MXU fast path), f32 acc.
    h2 = jnp.dot(h1.astype(jnp.bfloat16), w2_ref[...],
                 preferred_element_type=jnp.float32) + b2_ref[...]
    # numerically stable log_softmax over last dim
    m = jnp.max(h2, axis=-1, keepdims=True)
    s = h2 - m
    lse = jnp.log(jnp.sum(jnp.exp(s), axis=-1, keepdims=True))
    o_ref[...] = (s - lse).astype(o_ref.dtype)


def model_forward(x, w1, b1, w2, b2, *, tile_b_max=TILE_B_MAX):
    B = x.shape[0]
    F, H = w1.shape
    n_out = w2.shape[1]

    # torch-style .view(B, -1); reshape is layout-preserving (no copy), dtype untouched.
    x_flat = x.reshape(B, -1)
    assert x_flat.shape[1] == F

    # Tile selection: minimize over-padding, and give v7x's two TensorCores
    # something to split once the batch is big enough to matter.
    nt = max(1, _cdiv(B, tile_b_max))
    if B >= 256 and nt < 2:
        nt = 2
    tb = _round_up(_cdiv(B, nt), MIN_SUBLANE)
    padded_B = nt * tb
    if padded_B != B:
        # Minimal pad (< nt * 8 rows); zero rows are numerically safe and sliced off.
        x_flat = jnp.pad(x_flat, ((0, padded_B - B), (0, 0)))
    grid = (nt,)

    # Tiny resident operands: bf16 weights (MXU fast path), f32 biases.
    w1_bf = w1.astype(jnp.bfloat16)
    w2_bf = w2.astype(jnp.bfloat16)
    b1_f = b1.reshape(1, -1).astype(jnp.float32)
    b2_f = b2.reshape(1, -1).astype(jnp.float32)

    cost = pl.CostEstimate(
        flops=2 * padded_B * F * H + 2 * padded_B * H * n_out,
        transcendentals=padded_B * n_out,                 # exp in log_softmax
        bytes_accessed=padded_B * F * 4                   # x (f32, dominant)
        + F * H * 2 + H * 4 + H * n_out * 2 + n_out * 4   # weights/biases
        + padded_B * n_out * 4,                           # output (f32)
    )

    out = pl.pallas_call(
        mlp_kernel,
        out_shape=jax.ShapeDtypeStruct((padded_B, n_out), jnp.float32),
        grid=grid,
        in_specs=[
            pl.BlockSpec((tb, F), lambda i: (i, 0)),       # x: streamed over batch
            pl.BlockSpec((F, H), lambda i: (0, 0)),        # w1: VMEM-resident
            pl.BlockSpec((1, H), lambda i: (0, 0)),        # b1: resident
            pl.BlockSpec((H, n_out), lambda i: (0, 0)),    # w2: resident
            pl.BlockSpec((1, n_out), lambda i: (0, 0)),    # b2: resident
        ],
        out_specs=pl.BlockSpec((tb, n_out), lambda i: (i, 0)),
        compiler_params=pltpu.CompilerParams(
            dimension_semantics=("parallel",),             # dual-TC on v7x
            vmem_limit_bytes=VMEM_LIMIT,
        ),
        cost_estimate=cost,
    )(x_flat, w1_bf, b1_f, w2_bf, b2_f)

    return out[:B]


def init_params(key, in_features, hidden=32, n_out=10):
    # Deterministic init mimicking torch.nn.Linear defaults (uniform +/- 1/sqrt(fan_in))
    k1, k2, k3, k4 = jax.random.split(key, 4)
    lim1 = 1.0 / jnp.sqrt(in_features)
    lim2 = 1.0 / jnp.sqrt(hidden)
    w1 = jax.random.uniform(k1, (in_features, hidden), jnp.float32, -lim1, lim1)
    b1 = jax.random.uniform(k2, (hidden,), jnp.float32, -lim1, lim1)
    w2 = jax.random.uniform(k3, (hidden, n_out), jnp.float32, -lim2, lim2)
    b2 = jax.random.uniform(k4, (n_out,), jnp.float32, -lim2, lim2)
    return w1, b1, w2, b2


def _reference(x, w1, b1, w2, b2):
    # pure-JAX f32 reference for sanity checking
    h = x.reshape(x.shape[0], -1)
    h = jnp.where(h > 0, h, NEG_SLOPE * h)
    h = h @ w1 + b1
    h = jnp.where(h > 0, h, NEG_SLOPE * h)
    h = h @ w2 + b2
    return jax.nn.log_softmax(h, axis=-1)


def _check(x, w1, b1, w2, b2):
    out = model_forward(x, w1, b1, w2, b2)
    jax.block_until_ready(out)
    assert out.shape == (x.shape[0], 10)
    # log_softmax rows should sum (in prob space) to ~1
    probs_sum = jnp.sum(jnp.exp(out), axis=1)
    assert jnp.allclose(probs_sum, 1.0, atol=1e-3)
    # match the f32 reference within bf16-matmul tolerance
    ref = _reference(x, w1, b1, w2, b2)
    assert jnp.allclose(out, ref, atol=5e-2, rtol=5e-2)


if __name__ == "__main__":
    key = jax.random.PRNGKey(0)
    kx, kx2, kp = jax.random.split(key, 3)
    B, C, H, W = 2, 4, 16, 16
    in_features = C * H * W                       # LazyLinear infers 1024
    w1, b1, w2, b2 = init_params(kp, in_features)

    # small batch (single tile)
    x = jax.random.normal(kx, (B, C, H, W), jnp.float32)
    _check(x, w1, b1, w2, b2)

    # larger batch exercising the multi-tile / multi-core path
    x2 = jax.random.normal(kx2, (300, C, H, W), jnp.float32)
    _check(x2, w1, b1, w2, b2)

    print("KERNEL_OK")
</pallas_src>

<mosaic_0001>
module attributes {stable_mosaic.version = 11 : i64} {
  func.func @mlp_kernel(%arg0: i32, %arg1: memref<8x1024xf32, #tpu.memory_space<vmem>>, %arg2: memref<1024x32xbf16, #tpu.memory_space<vmem>>, %arg3: memref<1x32xf32, #tpu.memory_space<vmem>>, %arg4: memref<32x10xbf16, #tpu.memory_space<vmem>>, %arg5: memref<1x10xf32, #tpu.memory_space<vmem>>, %arg6: memref<8x10xf32, #tpu.memory_space<vmem>>) attributes {dimension_semantics = [#tpu.dimension_semantics<parallel>], iteration_bounds = array<i64: 1>, scalar_prefetch = 0 : i64, scratch_operands = 0 : i64, tpu.core_type = #tpu.core_type<tc>, window_params = [{transform_indices = @transform_0, window_bounds = array<i64: 8, 1024>}, {pipeline_mode = #tpu.pipeline_mode<synchronous>, transform_indices = @transform_1, window_bounds = array<i64: 1024, 32>}, {pipeline_mode = #tpu.pipeline_mode<synchronous>, transform_indices = @transform_2, window_bounds = array<i64: 1, 32>}, {pipeline_mode = #tpu.pipeline_mode<synchronous>, transform_indices = @transform_3, window_bounds = array<i64: 32, 10>}, {pipeline_mode = #tpu.pipeline_mode<synchronous>, transform_indices = @transform_4, window_bounds = array<i64: 1, 10>}, {transform_indices = @transform_5, window_bounds = array<i64: 8, 10>}]} {
    %c0 = arith.constant 0 : index
    %c0_0 = arith.constant 0 : index
    %0 = vector.load %arg1[%c0, %c0_0] : memref<8x1024xf32, #tpu.memory_space<vmem>>, vector<8x1024xf32>
    %cst = arith.constant 0.000000e+00 : f32
    %1 = vector.broadcast %cst : f32 to vector<8x1024xf32>
    %2 = arith.cmpf ogt, %0, %1 : vector<8x1024xf32>
    %cst_1 = arith.constant 0.00999999977 : f32
    %3 = vector.broadcast %cst_1 : f32 to vector<8x1024xf32>
    %4 = arith.mulf %3, %0 : vector<8x1024xf32>
    %5 = arith.select %2, %0, %4 : vector<8x1024xi1>, vector<8x1024xf32>
    %6 = arith.truncf %5 : vector<8x1024xf32> to vector<8x1024xbf16>
    %c0_2 = arith.constant 0 : index
    %c0_3 = arith.constant 0 : index
    %7 = vector.load %arg2[%c0_2, %c0_3] : memref<1024x32xbf16, #tpu.memory_space<vmem>>, vector<1024x32xbf16>
    %cst_4 = arith.constant dense<0.000000e+00> : vector<8x32xf32>
    %8 = tpu.matmul %6, %7, %cst_4 {dimension_numbers = #tpu.dot_dimension_numbers<[1], [0], [0], [1], [0, 0, 1, 1], [], []>} : vector<8x1024xbf16>, vector<1024x32xbf16>, vector<8x32xf32> -> vector<8x32xf32>
    %c0_5 = arith.constant 0 : index
    %c0_6 = arith.constant 0 : index
    %9 = vector.load %arg3[%c0_5, %c0_6] : memref<1x32xf32, #tpu.memory_space<vmem>>, vector<1x32xf32>
    %10 = vector.broadcast %9 : vector<1x32xf32> to vector<8x32xf32>
    %11 = arith.addf %8, %10 : vector<8x32xf32>
    %cst_7 = arith.constant 0.000000e+00 : f32
    %12 = vector.broadcast %cst_7 : f32 to vector<8x32xf32>
    %13 = arith.cmpf ogt, %11, %12 : vector<8x32xf32>
    %cst_8 = arith.constant 0.00999999977 : f32
    %14 = vector.broadcast %cst_8 : f32 to vector<8x32xf32>
    %15 = arith.mulf %14, %11 : vector<8x32xf32>
    %16 = arith.select %13, %11, %15 : vector<8x32xi1>, vector<8x32xf32>
    %17 = arith.truncf %16 : vector<8x32xf32> to vector<8x32xbf16>
    %c0_9 = arith.constant 0 : index
    %c0_10 = arith.constant 0 : index
    %18 = vector.load %arg4[%c0_9, %c0_10] : memref<32x10xbf16, #tpu.memory_space<vmem>>, vector<32x10xbf16>
    %cst_11 = arith.constant dense<0.000000e+00> : vector<8x10xf32>
    %19 = tpu.matmul %17, %18, %cst_11 {dimension_numbers = #tpu.dot_dimension_numbers<[1], [0], [0], [1], [0, 0, 1, 1], [], []>} : vector<8x32xbf16>, vector<32x10xbf16>, vector<8x10xf32> -> vector<8x10xf32>
    %c0_12 = arith.constant 0 : index
    %c0_13 = arith.constant 0 : index
    %20 = vector.load %arg5[%c0_12, %c0_13] : memref<1x10xf32, #tpu.memory_space<vmem>>, vector<1x10xf32>
    %21 = vector.broadcast %20 : vector<1x10xf32> to vector<8x10xf32>
    %22 = arith.addf %19, %21 : vector<8x10xf32>
    %cst_14 = arith.constant dense<0xFF800000> : vector<8xf32>
    %23 = vector.multi_reduction <maximumf>, %22, %cst_14 [1] : vector<8x10xf32> to vector<8xf32>
    %24 = vector.shape_cast %23 : vector<8xf32> to vector<8x1xf32>
    %25 = vector.broadcast %24 : vector<8x1xf32> to vector<8x10xf32>
    %26 = arith.subf %22, %25 : vector<8x10xf32>
    %27 = math.exp %26 : vector<8x10xf32>
    %cst_15 = arith.constant dense<0.000000e+00> : vector<8xf32>
    %28 = vector.multi_reduction <add>, %27, %cst_15 [1] : vector<8x10xf32> to vector<8xf32>
    %29 = vector.shape_cast %28 : vector<8xf32> to vector<8x1xf32>
    %30 = math.log %29 : vector<8x1xf32>
    %31 = vector.broadcast %30 : vector<8x1xf32> to vector<8x10xf32>
    %32 = arith.subf %26, %31 : vector<8x10xf32>
    %c0_16 = arith.constant 0 : index
    %c0_17 = arith.constant 0 : index
    %33 = vector.load %arg6[%c0_16, %c0_17] : memref<8x10xf32, #tpu.memory_space<vmem>>, vector<8x10xf32>
    tpu.vector_store %arg6[%c0_16, %c0_17], %32 {strides = array<i32>} : memref<8x10xf32, #tpu.memory_space<vmem>>, vector<8x10xf32>,
    return
  }
  func.func @transform_0(%arg0: i32) -> (i32, i32) {
    %c0_i32 = arith.constant 0 : i32
    %c0_i32_0 = arith.constant 0 : i32
    return %arg0, %c0_i32 : i32, i32
  }
  func.func @transform_1(%arg0: i32) -> (i32, i32) {
    %c0_i32 = arith.constant 0 : i32
    %c0_i32_0 = arith.constant 0 : i32
    %c0_i32_1 = arith.constant 0 : i32
    return %c0_i32, %c0_i32_0 : i32, i32
  }
  func.func @transform_2(%arg0: i32) -> (i32, i32) {
    %c0_i32 = arith.constant 0 : i32
    %c0_i32_0 = arith.constant 0 : i32
    %c0_i32_1 = arith.constant 0 : i32
    return %c0_i32, %c0_i32_0 : i32, i32
  }
  func.func @transform_3(%arg0: i32) -> (i32, i32) {
    %c0_i32 = arith.constant 0 : i32
    %c0_i32_0 = arith.constant 0 : i32
    %c0_i32_1 = arith.constant 0 : i32
    return %c0_i32, %c0_i32_0 : i32, i32
  }
  func.func @transform_4(%arg0: i32) -> (i32, i32) {
    %c0_i32 = arith.constant 0 : i32
    %c0_i32_0 = arith.constant 0 : i32
    %c0_i32_1 = arith.constant 0 : i32
    return %c0_i32, %c0_i32_0 : i32, i32
  }
  func.func @transform_5(%arg0: i32) -> (i32, i32) {
    %c0_i32 = arith.constant 0 : i32
    %c0_i32_0 = arith.constant 0 : i32
    return %arg0, %c0_i32 : i32, i32
  }
}

</mosaic_0001>

<bundles_post_ra>
// kernel: tpu_custom_call.1
= control target key start
LH: loop header
LB: loop body
LE: loop exit
PB: predicated region body
PF: predicated region fallthrough
CT: control target
= control target key end

     0   :  { %s1370_s0 = inlined_call_operand.vmem [shape: f32[8,1024], index: 0, kind: input, shape index: {}]   ;;  %s1371_s1 = inlined_call_operand.vmem [shape: bf16[1024,32], index: 1, kind: input, shape index: {}]   ;;  %s1372_s2 = inlined_call_operand.vmem [shape: f32[1,32], index: 2, kind: input, shape index: {}]   ;;  %s1373_s3 = inlined_call_operand.vmem [shape: bf16[32,10], index: 3, kind: input, shape index: {}]   ;;  %s1374_s4 = inlined_call_operand.vmem [shape: f32[1,10], index: 4, kind: input, shape index: {}]   ;;  %s1375_s5 = inlined_call_operand.hbm [shape: f32[8,10], index: 5, kind: output, shape index: {}]  }
   0x1   :  { %v1011_v0 = vld [vmem:[%s1371_s1 + $0x78] sm:$0xff]   ;;  %v1015_v4 = vld [vmem:[%s1371_s1 + $0x70] sm:$0xff]   ;;  %v1019_v8 = vld [vmem:[%s1371_s1 + $0x68] sm:$0xff]  }
   0x2   :  { %v1012_v1 = vld [vmem:[%s1371_s1 + $0xf8] sm:$0xff]   ;;  %909 = vmatprep.subr.bf16.mxu0 %v1011_v0  ;;  %v1016_v5 = vld [vmem:[%s1371_s1 + $0xf0] sm:$0xff]   ;;  %v1020_v9 = vld [vmem:[%s1371_s1 + $0xe8] sm:$0xff]  }
   0x3   :  { %v1013_v2 = vld [vmem:[%s1371_s1 + $0x38] sm:$0xff]   ;;  %931 = vmatprep.subr.bf16.mxu1 %v1012_v1  ;;  %v1017_v6 = vld [vmem:[%s1371_s1 + $0x30] sm:$0xff]   ;;  %v1021_v10 = vld [vmem:[%s1371_s1 + $0x28] sm:$0xff]  }
   0x4   :  { %v1014_v3 = vld [vmem:[%s1371_s1 + $0xb8] sm:$0xff]   ;;  %910 = vmatpush3.bf16.msra.mxu0 %v1013_v2  ;;  %v1018_v7 = vld [vmem:[%s1371_s1 + $0xb0] sm:$0xff]   ;;  %v1022_v11 = vld [vmem:[%s1371_s1 + $0xa8] sm:$0xff]  }
   0x5   :  { %932 = vmatpush3.bf16.msra.mxu1 %v1014_v3  ;;  %911 = vmatprep.subr.bf16.mxu0 %v1015_v4  ;;  %v1023_v12 = vld [vmem:[%s1371_s1 + $0x60] sm:$0xff]   ;;  %v1027_v16 = vld [vmem:[%s1371_s1 + $0x58] sm:$0xff]   ;;  %v1031_v20 = vld [vmem:[%s1371_s1 + $0x50] sm:$0xff]  }
   0x6   :  { %933 = vmatprep.subr.bf16.mxu1 %v1016_v5  ;;  %v1024_v13 = vld [vmem:[%s1371_s1 + $0xe0] sm:$0xff]   ;;  %v1028_v17 = vld [vmem:[%s1371_s1 + $0xd8] sm:$0xff]   ;;  %v1032_v21 = vld [vmem:[%s1371_s1 + $0xd0] sm:$0xff]  }
   0x7   :  { %v1025_v14 = vld [vmem:[%s1371_s1 + $0x20] sm:$0xff]   ;;  %v1029_v18 = vld [vmem:[%s1371_s1 + $0x18] sm:$0xff]   ;;  %v1033_v22 = vld [vmem:[%s1371_s1 + $0x10] sm:$0xff]  }
   0x8   :  { %912 = vmatpush3.bf16.msra.mxu0 %v1017_v6  ;;  %v1026_v15 = vld [vmem:[%s1371_s1 + $0xa0] sm:$0xff]   ;;  %v1030_v19 = vld [vmem:[%s1371_s1 + $0x98] sm:$0xff]   ;;  %v1034_v23 = vld [vmem:[%s1371_s1 + $0x90] sm:$0xff]  }
   0x9   :  { %934 = vmatpush3.bf16.msra.mxu1 %v1018_v7  ;;  %913 = vmatprep.subr.bf16.mxu0 %v1019_v8  ;;  %v1035_v24 = vld [vmem:[%s1371_s1 + $0x48] sm:$0xff]   ;;  %v1039_v28 = vld [vmem:[%s1371_s1 + $0x40] sm:$0xff]   ;;  %v25_v33 = vld [vmem:[%s1370_s0 + $0x18] sm:$0xff] }
   0xa   :  { %935 = vmatprep.subr.bf16.mxu1 %v1020_v9  ;;  %v1036_v25 = vld [vmem:[%s1371_s1 + $0xc8] sm:$0xff]   ;;  %v1040_v29 = vld [vmem:[%s1371_s1 + $0xc0] sm:$0xff]   ;;  %vm33_vm1 = vcmp.gt.f32.partialorder %v25_v33, 0.0  ;;  %v41_v36 = vmul.f32 0.01, %v25_v33  ;;  %v24_v38 = vld [vmem:[%s1370_s0 + $0x10] sm:$0xff] }
   0xb   :  { %v1037_v26 = vld [vmem:[%s1371_s1 + $0x8] sm:$0xff]   ;;  %v1041_v30 = vld [vmem:[%s1371_s1] sm:$0xff]   ;;  %vm32_vm3 = vcmp.gt.f32.partialorder %v24_v38, 0.0  ;;  %v40_v41 = vmul.f32 0.01, %v24_v38  ;;  %v1043_v42 = vld [vmem:[%s1371_s1 + $0x178] sm:$0xff]  }
   0xc   :  { %914 = vmatpush3.bf16.msra.mxu0 %v1021_v10  ;;  %v1038_v27 = vld [vmem:[%s1371_s1 + $0x88] sm:$0xff]   ;;  %v1042_v31 = vld [vmem:[%s1371_s1 + $0x80] sm:$0xff]   ;;  %v49_v40 = vsel %vm33_vm1, %v25_v33, %v41_v36  ;;  %v1044_v46 = vld [vmem:[%s1371_s1 + $0x1f8] sm:$0xff]  }
   0xd   :  { %936 = vmatpush3.bf16.msra.mxu1 %v1022_v11  ;;  %915 = vmatprep.subr.bf16.mxu0 %v1023_v12  ;;  %v23_v32 = vld [vmem:[%s1370_s0 + $0x8] sm:$0xff]  ;;  %v22_v34 = vld [vmem:[%s1370_s0] sm:$0xff]  ;;  %v57_v44 = vpack.c.bf16 %v49_v40, %v49_v40  ;;  %v48_v48 = vsel %vm32_vm3, %v24_v38, %v40_v41  ;;  %v1045_v49 = vld [vmem:[%s1371_s1 + $0x138] sm:$0xff]  }
   0xe   :  { %937 = vmatprep.subr.bf16.mxu1 %v1024_v13  ;;  %vm31_vm0 = vcmp.gt.f32.partialorder %v23_v32, 0.0  ;;  %v39_v35 = vmul.f32 0.01, %v23_v32  ;;  %vm30_vm2 = vcmp.gt.f32.partialorder %v22_v34, 0.0  ;;  %v38_v37 = vmul.f32 0.01, %v22_v34 }
   0xf   :  { %653 = vmatprep.mubr.bf16.mxu1 %v57_v44  ;;  %v56_v50 = vpack.c.bf16 %v48_v48, %v48_v48  ;;  %v1046_v51 = vld [vmem:[%s1371_s1 + $0x1b8] sm:$0xff]   ;;  %v1047_v52 = vld [vmem:[%s1371_s1 + $0x170] sm:$0xff]   ;;  %v1051_v56 = vld [vmem:[%s1371_s1 + $0x168] sm:$0xff]  }
  0x10   :  { %916 = vmatpush3.bf16.msra.mxu0 %v1025_v14  ;;  %v47_v39 = vsel %vm31_vm0, %v23_v32, %v39_v35  ;;  %v46_v45 = vsel %vm30_vm2, %v22_v34, %v38_v37  ;;  %v1048_v53 = vld [vmem:[%s1371_s1 + $0x1f0] sm:$0xff]   ;;  %v1052_v57 = vld [vmem:[%s1371_s1 + $0x1e8] sm:$0xff]   ;;  %v1055_v60 = vld [vmem:[%s1371_s1 + $0x160] sm:$0xff]  }
  0x11   :  { %938 = vmatpush3.bf16.msra.mxu1 %v1026_v15  ;;  %917 = vmatprep.subr.bf16.mxu0 %v1027_v16  ;;  %v55_v43 = vpack.c.bf16 %v47_v39, %v47_v39  ;;  %v54_v47 = vpack.c.bf16 %v46_v45, %v46_v45  ;;  %v1049_v54 = vld [vmem:[%s1371_s1 + $0x130] sm:$0xff]   ;;  %v1053_v58 = vld [vmem:[%s1371_s1 + $0x128] sm:$0xff]   ;;  %v1056_v61 = vld [vmem:[%s1371_s1 + $0x1e0] sm:$0xff]  }
  0x12   :  { %939 = vmatprep.subr.bf16.mxu1 %v1028_v17  ;;  %v1050_v55 = vld [vmem:[%s1371_s1 + $0x1b0] sm:$0xff]   ;;  %v1054_v59 = vld [vmem:[%s1371_s1 + $0x1a8] sm:$0xff]   ;;  %v1057_v62 = vld [vmem:[%s1371_s1 + $0x120] sm:$0xff]  }
  0x13   :  { %613 = vmatprep.mubr.bf16.mxu0 %v55_v43  ;;  %v1058_v63 = vld [vmem:[%s1371_s1 + $0x1a0] sm:$0xff]   ;;  %v1059_v0 = vld [vmem:[%s1371_s1 + $0x158] sm:$0xff]   ;;  %v1063_v4 = vld [vmem:[%s1371_s1 + $0x150] sm:$0xff]  }
  0x14   :  { %918 = vmatpush3.bf16.msra.mxu0 %v1029_v18  ;;  %v1060_v1 = vld [vmem:[%s1371_s1 + $0x1d8] sm:$0xff]   ;;  %v1064_v5 = vld [vmem:[%s1371_s1 + $0x1d0] sm:$0xff]   ;;  %v1067_v8 = vld [vmem:[%s1371_s1 + $0x148] sm:$0xff]  }
  0x15   :  { %940 = vmatpush3.bf16.msra.mxu1 %v1030_v19  ;;  %919 = vmatprep.subr.bf16.mxu0 %v1031_v20  ;;  %v1061_v2 = vld [vmem:[%s1371_s1 + $0x118] sm:$0xff]   ;;  %v1065_v6 = vld [vmem:[%s1371_s1 + $0x110] sm:$0xff]   ;;  %v1068_v9 = vld [vmem:[%s1371_s1 + $0x1c8] sm:$0xff]  }
  0x16   :  { %941 = vmatprep.subr.bf16.mxu1 %v1032_v21  ;;  %v1062_v3 = vld [vmem:[%s1371_s1 + $0x198] sm:$0xff]   ;;  %v1066_v7 = vld [vmem:[%s1371_s1 + $0x190] sm:$0xff]   ;;  %v1069_v10 = vld [vmem:[%s1371_s1 + $0x108] sm:$0xff]  }
  0x17   :  { %v1070_v11 = vld [vmem:[%s1371_s1 + $0x188] sm:$0xff]   ;;  %v1071_v12 = vld [vmem:[%s1371_s1 + $0x140] sm:$0xff]   ;;  %v29_v17 = vld [vmem:[%s1370_s0 + $0x38] sm:$0xff] }
  0x18   :  { %920 = vmatpush3.bf16.msra.mxu0 %v1033_v22  ;;  %v1072_v13 = vld [vmem:[%s1371_s1 + $0x1c0] sm:$0xff]   ;;  %v27_v16 = vld [vmem:[%s1370_s0 + $0x28] sm:$0xff]  ;;  %vm37_vm5 = vcmp.gt.f32.partialorder %v29_v17, 0.0  ;;  %v45_v20 = vmul.f32 0.01, %v29_v17  ;;  %v28_v22 = vld [vmem:[%s1370_s0 + $0x30] sm:$0xff] }
  0x19   :  { %942 = vmatpush3.bf16.msra.mxu1 %v1034_v23  ;;  %921 = vmatprep.subr.bf16.mxu0 %v1035_v24  ;;  %v1073_v14 = vld [vmem:[%s1371_s1 + $0x100] sm:$0xff]   ;;  %vm35_vm4 = vcmp.gt.f32.partialorder %v27_v16, 0.0  ;;  %v43_v19 = vmul.f32 0.01, %v27_v16  ;;  %vm36_vm7 = vcmp.gt.f32.partialorder %v28_v22, 0.0 }
  0x1a   :  { %943 = vmatprep.subr.bf16.mxu1 %v1036_v25  ;;  %v1074_v15 = vld [vmem:[%s1371_s1 + $0x180] sm:$0xff]   ;;  %v53_v24 = vsel %vm37_vm5, %v29_v17, %v45_v20  ;;  %v44_v25 = vmul.f32 0.01, %v28_v22 }
  0x1b   :  { %v26_v18 = vld [vmem:[%s1370_s0 + $0x20] sm:$0xff]  ;;  %v51_v23 = vsel %vm35_vm4, %v27_v16, %v43_v19 }
  0x1c   :  { %922 = vmatpush3.bf16.msra.mxu0 %v1037_v26  ;;  %vm34_vm6 = vcmp.gt.f32.partialorder %v26_v18, 0.0  ;;  %v42_v21 = vmul.f32 0.01, %v26_v18  ;;  %v59_v26 = vpack.c.bf16 %v51_v23, %v51_v23 }
  0x1d   :  { %944 = vmatpush3.bf16.msra.mxu1 %v1038_v27  ;;  %923 = vmatprep.subr.bf16.mxu0 %v1039_v28  ;;  %v61_v27 = vpack.c.bf16 %v53_v24, %v53_v24 }
  0x1e   :  { %945 = vmatprep.subr.bf16.mxu1 %v1040_v29  ;;  %v50_v28 = vsel %vm34_vm6, %v26_v18, %v42_v21 }
  0x20   :  { %924 = vmatpush3.bf16.msra.mxu0 %v1041_v30 }
  0x21   :  { %946 = vmatpush3.bf16.msra.mxu1 %v1042_v31  ;;  %953 = vmatprep.subr.bf16.mxu0 %v1043_v42 }
  0x22   :  { %975 = vmatprep.subr.bf16.mxu1 %v1044_v46 }
  0x23   :  { %614 = vmatmul.mubr.bf16.vlgmr.msra.gmra.mxu0 %v54_v47 }
  0x24   :  { %654 = vmatmul.mubr.bf16.vlgmr.msra.gmra.mxu1 %v56_v50  ;;  %954 = vmatpush3.bf16.msra.mxu0 %v1045_v49 }
  0x25   :  { %976 = vmatpush3.bf16.msra.mxu1 %v1046_v51  ;;  %955 = vmatprep.subr.bf16.mxu0 %v1047_v52 }
  0x26   :  { %977 = vmatprep.subr.bf16.mxu1 %v1048_v53 }
  0x28   :  { %956 = vmatpush3.bf16.msra.mxu0 %v1049_v54 }
  0x29   :  { %978 = vmatpush3.bf16.msra.mxu1 %v1050_v55  ;;  %957 = vmatprep.subr.bf16.mxu0 %v1051_v56 }
  0x2a   :  { %979 = vmatprep.subr.bf16.mxu1 %v1052_v57 }
  0x2c   :  { %958 = vmatpush3.bf16.msra.mxu0 %v1053_v58 }
  0x2d   :  { %980 = vmatpush3.bf16.msra.mxu1 %v1054_v59  ;;  %959 = vmatprep.subr.bf16.mxu0 %v1055_v60 }
  0x2e   :  { %981 = vmatprep.subr.bf16.mxu1 %v1056_v61 }
  0x30   :  { %960 = vmatpush3.bf16.msra.mxu0 %v1057_v62 }
  0x31   :  { %982 = vmatpush3.bf16.msra.mxu1 %v1058_v63  ;;  %961 = vmatprep.subr.bf16.mxu0 %v1059_v0 }
  0x32   :  { %983 = vmatprep.subr.bf16.mxu1 %v1060_v1 }
  0x34   :  { %962 = vmatpush3.bf16.msra.mxu0 %v1061_v2 }
  0x35   :  { %984 = vmatpush3.bf16.msra.mxu1 %v1062_v3  ;;  %963 = vmatprep.subr.bf16.mxu0 %v1063_v4 }
  0x36   :  { %985 = vmatprep.subr.bf16.mxu1 %v1064_v5 }
  0x38   :  { %964 = vmatpush3.bf16.msra.mxu0 %v1065_v6 }
  0x39   :  { %986 = vmatpush3.bf16.msra.mxu1 %v1066_v7  ;;  %965 = vmatprep.subr.bf16.mxu0 %v1067_v8 }
  0x3a   :  { %987 = vmatprep.subr.bf16.mxu1 %v1068_v9 }
  0x3c   :  { %966 = vmatpush3.bf16.msra.mxu0 %v1069_v10 }
  0x3d   :  { %988 = vmatpush3.bf16.msra.mxu1 %v1070_v11  ;;  %967 = vmatprep.subr.bf16.mxu0 %v1071_v12 }
  0x3e   :  { %989 = vmatprep.subr.bf16.mxu1 %v1072_v13 }
  0x40   :  { %968 = vmatpush3.bf16.msra.mxu0 %v1073_v14 }
  0x41   :  { %990 = vmatpush3.bf16.msra.mxu1 %v1074_v15 }
  0x42   :  { %10 = vsyncpa [#allocation3], 0  ;;  %v58_v29 = vpack.c.bf16 %v50_v28, %v50_v28  ;;  %v52_v30 = vsel %vm36_vm7, %v28_v22, %v44_v25  ;;  %693 = vmatprep.mubr.bf16.mxu0 %v59_v26  ;;  %733 = vmatprep.mubr.bf16.mxu1 %v61_v27  ;;  %v1075_v32 = vld [vmem:[%s1373_s3 + $0x8] sm:$0xff]   ;;  %v1103_v33 = vmov 0.0   ;;  %v1076_v34 = vld [vmem:[%s1373_s3] sm:$0xff]   ;;  %vm1104_vm8 = vmmov 0  }
  0x43   :  { %v60_v31 = vpack.c.bf16 %v52_v30, %v52_v30  ;;  %1000 = vmatprep.subr.bf16.mxu0 %v1103_v33  ;;  %v840_v44 = vld [vmem:[%s1372_s2] ss:$0 sm:$0xff]  ;;  %vm768_vm10 = vcmask 261120   ;;  %vm812_vm11 = vcmask 80896  }
  0x44   :  { %694 = vmatmul.mubr.bf16.vlgmr.msra.gmra.mxu0 %v58_v29  ;;  %v905_v63 = vld [vmem:[%s1374_s4] ss:$0 sm:$0xff]  ;;  %s1105_s4 = smov [#allocation2]  }
  0x45   :  { %734 = vmatmul.mubr.bf16.vlgmr.msra.gmra.mxu1 %v60_v31  ;;  %1001 = vmatpush3.bf16.msra.mxu0 %v1075_v32  ;;  %s832_s16 = sshll.u32 %s1105_s4, 4  ;;  %s833_s16 = int_to_ptr.vmem [resolvable:$true] %s832_s16 }
  0x46   :  { %1002 = vmatprep.subr.bf16.mxu0 %v1103_v33  ;;  %1004 = vmatprep.mubr.msk.bf16.mxu0 %vm1104_vm8, %v1103_v33  ;;  %s1081_s17 = scalar_lea.vmem %s833_s16, 128  ;;  %p1086_p1 = scmp.lt.s32.totalorder %s833_s16, %s833_s16 }
  0x47   :  { %p1082_p0 = scmp.ne.s32.totalorder %s833_s16, %s1081_s17  ;;  %p1087_p2 = scmp.lt.s32.totalorder %s1081_s17, %s1081_s17 }
  0x49   :  { %1003 = vmatpush3.bf16.msra.mxu0 %v1076_v34  ;;  %p1088_p3 = por %p1087_p2, %p1086_p1 }
  0x4b   :  { %p1089_p4 = pnand %p1088_p3, %p1082_p0 }
  0xe3   :  { %v925_v35 = vpop.f32.mrf.mxu0 }
  0xe4   :  { %v947_v36 = vpop.f32.mrf.mxu1 }
  0xe5   :  { %v926_v37 = vpop.f32.mrf.mxu0 }
  0xe6   :  { %v948_v38 = vpop.f32.mrf.mxu1  ;;  %v927_v43 = vadd.f32 %v926_v37, %v925_v35 }
  0xe7   :  { %v928_v39 = vpop.f32.mrf.mxu0  ;;  %v949_v46 = vadd.f32 %v948_v38, %v947_v36 }
  0xe8   :  { %v950_v40 = vpop.f32.mrf.mxu1  ;;  %v616_v45 = vadd.f32 %v927_v43, %v840_v44 }
  0xe9   :  { %v929_v41 = vpop.f32.mrf.mxu0 }
  0xea   :  { %v951_v42 = vpop.f32.mrf.mxu1  ;;  %v656_v50 = vadd.f32 %v949_v46, %v616_v45 }
 0x104   :  { %v969_v47 = vpop.f32.mrf.mxu0 }
 0x105   :  { %v991_v48 = vpop.f32.mrf.mxu1 }
 0x106   :  { %v970_v49 = vpop.f32.mrf.mxu0 }
 0x107   :  { %v971_v51 = vadd.f32 %v970_v49, %v969_v47  ;;  %v992_v52 = vpop.f32.mrf.mxu1 }
 0x108   :  { %v972_v53 = vpop.f32.mrf.mxu0  ;;  %v993_v55 = vadd.f32 %v992_v52, %v991_v48 }
 0x109   :  { %v696_v54 = vadd.f32 %v971_v51, %v656_v50  ;;  %v994_v56 = vpop.f32.mrf.mxu1 }
 0x10a   :  { %v973_v57 = vpop.f32.mrf.mxu0 }
 0x10b   :  { %v736_v58 = vadd.f32 %v993_v55, %v696_v54  ;;  %v995_v59 = vpop.f32.mrf.mxu1 }
 0x10d   :  { %vm741_vm9 = vcmp.gt.f32.partialorder %v736_v58, 0.0  ;;  %v742_v60 = vmul.f32 0.01, %v736_v58 }
 0x10f   :  { %v743_v61 = vsel %vm741_vm9, %v736_v58, %v742_v60 }
 0x110   :  { %v744_v62 = vpack.c.bf16 %v743_v61, %v743_v61 }
 0x112   :  { %1005 = vmatmul.mubr.msk.bf16.vlgmr.msra.gmra.mxu0 %vm768_vm10, %v744_v62 }
 0x1d2   :  { %v806_v0 = vpop.f32.mrf.mxu0 }
 0x1d3   :  { %v807_v1 = vadd.f32 %v905_v63, %v806_v0 }
 0x1d4   :  { %v1006_v2 = vpop.f32.mrf.mxu0 }
 0x1d5   :  { %v813_v3 = vsel %vm812_vm11, %v807_v1, -inf }
 0x1d6   :  { %814 = vmax.xlane.f32.xlu0 %v813_v3  ;;  %v809_v4 = vpop.f32.mrf.mxu0 }
 0x1d8   :  { %v1007_v5 = vpop.f32.mrf.mxu0 }
 0x25f   :  { %v815_v6 = vpop.xlane.xlu0 %814 }
 0x260   :  { %v816_v7 = vsub.f32 %v807_v1, %v815_v6 }
 0x262   :  { %v817_v8 = vmul.f32 1.442695, %v816_v7 }
 0x264   :  { %1077 = vpow2.f32 %v817_v8 }
 0x271   :  { %v1078_v9 = vpop.eup %1077 }
 0x272   :  { %v819_v10 = vsel %vm812_vm11, %v1078_v9, 0.0 }
 0x273   :  { %820 = vadd.xlane.f32.xlu0 %v819_v10 }
 0x2fc   :  { %v821_v11 = vpop.xlane.xlu0 %820 }
 0x2fd   :  { %1079 = vlog2.f32 %v821_v11 }
 0x30a   :  { %v1080_v12 = vpop.eup %1079 }
 0x30b   :  { %v823_v13 = vmul.f32 0.6931472, %v1080_v12 }
 0x30d   :  { %v824_v14 = vsub.f32 %v816_v7, %v823_v13 }
 0x30f   :  { %825 = vst.msk [vmem:[#allocation2] sm:$0xff] %vm812_vm11, %v824_v14 }
 0x310   :  { %1092 = shalt.err (!%p1089_p4)
}
 0x311   :  { %835 = dma.vmem_to_hbm [thread:$0]  %s833_s16, 128, %s1375_s5, [#allocation3]  }
 0x312   :  { %1101 = dma.done.wait [#allocation3], 128  }
 0x313   :  { %1102 = vsyncadd [#allocation3], 4294967168 }
 0x314   :  { %839 = vsyncpa [#allocation3], 1 }

</bundles_post_ra>
